<compile_context>
chip_gen: v7x
topology: tpu7x:2x2x1
jax: 0.10.0
libtpu: 0.0.40
codegen_flags: <defaults>
</compile_context>

<pallas_src>
import functools

import jax
import jax.numpy as jnp
from jax.experimental import pallas as pl
from jax.experimental.pallas import tpu as pltpu


def _round_up(x, m):
    return (x + m - 1) // m * m


# ----------------------------- Pallas kernel --------------------------------
def _deepfm_kernel(sp_dim, embed_dim, h1, mxu_dtype,
                   x_ref, w1e_ref, b1_ref, w2_ref, b2_ref, w3_ref,
                   bias_ref, out_ref):
    """Fused FM + DNN + sigmoid, batch on the lane axis.

    x_ref   : (Dext, TB) rows = [2nd-order embeds (field-major) | ds | 1st-order]
    w1e_ref : (H1+1, Dext) rows [0,H1) = dnn.w1^T (1st-order cols zeroed),
                           row H1     = [zeros | fm_fc.w | ones]
    b1_ref  : (H1, 1)   w2_ref: (H2, H1)  b2_ref: (H2, 1)  w3_ref: (H2, 1)
    bias_ref: (1, 1)    SMEM scalar = dnn.b3 + fm_fc.bias + final_bias
    out_ref : (1, TB)
    """
    x = x_ref[...]
    if x.dtype != jnp.float32:
        x = x.astype(jnp.float32)          # (optional bf16-streamed activations)
    se = sp_dim * embed_dim
    tb = x.shape[1]

    # ---- FM 2nd-order cross term: 0.5 * sum_e[(sum_f v)^2 - sum_f v^2] ----
    if embed_dim % 8 == 0:
        # Tile-aligned reshape: full-vreg VPU adds + one sublane (XLU) reduce.
        e = x[:se, :].reshape(sp_dim, embed_dim, tb)
        s = jnp.sum(e, axis=0)                                 # (E, TB)
        sq = jnp.sum(e * e, axis=0)                            # (E, TB)
    else:
        # Unaligned embed_dim: avoid a relayout -> short unrolled field loop.
        s = x[:embed_dim, :]
        sq = s * s
        for i in range(1, sp_dim):
            ei = x[i * embed_dim:(i + 1) * embed_dim, :]
            s = s + ei
            sq = sq + ei * ei
    cross = 0.5 * jnp.sum(s * s - sq, axis=0, keepdims=True)   # (1, TB)

    # ---- Extended first matmul on the MXU ----
    # rows [0,H1): DNN layer-1 pre-activation; row H1: fm dense + 1st-order sum.
    xm = x if x.dtype == mxu_dtype else x.astype(mxu_dtype)
    he = jnp.dot(w1e_ref[...], xm, preferred_element_type=jnp.float32)  # (H1+1, TB)
    fm_dl = he[h1:h1 + 1, :]                                   # (1, TB)
    h = jnp.maximum(he[:h1, :] + b1_ref[...], 0.0)             # (H1, TB)

    # ---- remaining DNN: Linear -> ReLU -> Linear(., 1) ----
    hm = h if h.dtype == mxu_dtype else h.astype(mxu_dtype)
    h = jnp.dot(w2_ref[...], hm, preferred_element_type=jnp.float32) + b2_ref[...]
    h = jnp.maximum(h, 0.0)                                    # (H2, TB)
    dnn = jnp.sum(w3_ref[...] * h, axis=0, keepdims=True)      # (1, TB)

    out_ref[...] = jax.nn.sigmoid(dnn + cross + fm_dl + bias_ref[0, 0])


def deepfm_pallas(x_ext, fm_w, fm_b, w1, b1, w2, b2, w3, b3, final_bias, *,
                  sp_dim, embed_dim, ds_dim, block_b=4096,
                  use_bf16_matmul=False):
    """x_ext: (Dext, B) batch-on-lanes activation (see _deepfm_kernel docstring)."""
    Dext, B = x_ext.shape
    se = sp_dim * embed_dim
    H1 = w1.shape[1]
    H2 = w2.shape[1]
    f32 = jnp.float32

    # ---- batch tile: lane-dense, large, but keep >=2 grid steps when possible.
    pB128 = _round_up(B, 128)
    tb = min(_round_up(block_b, 128), pB128)
    if pB128 // tb < 2 and pB128 >= 256:
        tb = _round_up(pB128 // 2, 128)      # >=2 steps -> both v7x TCs busy
    pB = _round_up(B, tb)
    n_steps = pB // tb

    x_p = x_ext if pB == B else jnp.pad(x_ext, ((0, 0), (0, pB - B)))

    # ---- extended layer-1 weight: fold fm_fc + 1st-order sum onto the MXU.
    mxu_dtype = jnp.bfloat16 if use_bf16_matmul else f32
    w1_t = jnp.concatenate(
        [w1.T.astype(f32), jnp.zeros((H1, sp_dim), f32)], axis=1)        # (H1, Dext)
    fm_row = jnp.concatenate(
        [jnp.zeros((1, se), f32), fm_w.reshape(1, ds_dim).astype(f32),
         jnp.ones((1, sp_dim), f32)], axis=1)                            # (1, Dext)
    w1e = jnp.concatenate([w1_t, fm_row], axis=0).astype(mxu_dtype)      # (H1+1, Dext)
    w2_t = w2.T.astype(mxu_dtype)                                        # (H2, H1)
    b1_c = b1.reshape(H1, 1).astype(f32)
    b2_c = b2.reshape(H2, 1).astype(f32)
    w3_c = w3.reshape(H2, 1).astype(f32)
    # Fold all (1,1) scalar biases into one SMEM scalar.
    bias_tot = (b3.reshape(()) + fm_b.reshape(()) + final_bias.reshape(())
                ).reshape(1, 1).astype(f32)

    kernel = functools.partial(_deepfm_kernel, sp_dim, embed_dim, H1, mxu_dtype)
    const = lambda i: (0, 0)

    # ---- VMEM budget (double-buffered activations + resident weights).
    act_tile_bytes = Dext * tb * x_p.dtype.itemsize
    w_bytes = ((H1 + 1) * Dext + H2 * H1 + H1 + 2 * H2) * 4
    vmem_limit = int(min(max(2 * (act_tile_bytes + tb * 4) + 2 * w_bytes + (4 << 20),
                             32 << 20), 64 << 20))

    cost = pl.CostEstimate(
        flops=int(2 * pB * ((H1 + 1) * Dext + H2 * H1 + H2) + 5 * pB * se),
        transcendentals=int(pB),
        bytes_accessed=int(n_steps * (act_tile_bytes + w_bytes) + pB * 4))

    out = pl.pallas_call(
        kernel,
        out_shape=jax.ShapeDtypeStruct((1, pB), f32),
        grid=(n_steps,),
        in_specs=[
            pl.BlockSpec((Dext, tb), lambda i: (0, i)),          # activations^T
            pl.BlockSpec((H1 + 1, Dext), const),                 # extended w1
            pl.BlockSpec((H1, 1), const),                        # b1
            pl.BlockSpec((H2, H1), const),                       # w2^T
            pl.BlockSpec((H2, 1), const),                        # b2
            pl.BlockSpec((H2, 1), const),                        # w3
            pl.BlockSpec(memory_space=pltpu.MemorySpace.SMEM),   # folded bias
        ],
        out_specs=pl.BlockSpec((1, tb), lambda i: (0, i)),
        compiler_params=pltpu.CompilerParams(
            dimension_semantics=("parallel",),
            vmem_limit_bytes=vmem_limit),
        cost_estimate=cost,
    )(x_p, w1e, b1_c, w2_t, b2_c, w3_c, bias_tot)

    return out[:, :B].T                                          # (B, 1)


# ------------------------------ JAX glue / model -----------------------------
def init_params(key, num_cats, ds_dim, sp_dim, embed_dim, hid_channels):
    keys = jax.random.split(key, 32)
    ki = iter(keys)
    params = {}
    # fm_fc : Linear(ds_dim, 1)
    params["fm_w"] = 0.1 * jax.random.normal(next(ki), (ds_dim, 1), jnp.float32)
    params["fm_b"] = 0.1 * jax.random.normal(next(ki), (1, 1), jnp.float32)
    # embedding tables
    params["emb1"] = [0.1 * jax.random.normal(next(ki), (num_cats[i], 1), jnp.float32)
                      for i in range(sp_dim)]
    params["emb2"] = [0.1 * jax.random.normal(next(ki), (num_cats[i], embed_dim), jnp.float32)
                      for i in range(sp_dim)]
    # DNN: [dense_input_dim] + hid_channels, then final Linear(hid[-1], 1)
    dense_input_dim = ds_dim + sp_dim * embed_dim
    dims = [dense_input_dim] + list(hid_channels) + [1]
    ws, bs = [], []
    for i in range(len(dims) - 1):
        ws.append(0.1 * jax.random.normal(next(ki), (dims[i], dims[i + 1]), jnp.float32))
        bs.append(0.1 * jax.random.normal(next(ki), (1, dims[i + 1]), jnp.float32))
    params["dnn_w"] = ws
    params["dnn_b"] = bs
    params["final_bias"] = jax.random.normal(next(ki), (1, 1), jnp.float32)
    return params


def build_activation(params, ds_input, sp_input, *, sp_dim,
                     act_dtype=jnp.float32):
    """Build the (Dext, B) batch-on-lanes activation directly in the gather glue.

    Row layout: [2nd-order embeddings (field-major) | ds features | 1st-order].
    No standalone full-activation transpose/pad pass over HBM."""
    parts = [params["emb2"][i][sp_input[:, i]].T for i in range(sp_dim)]   # (E, B)
    parts.append(ds_input.T)                                               # (ds, B)
    parts += [params["emb1"][i][sp_input[:, i]].T for i in range(sp_dim)]  # (1, B)
    # TODO(synk): store the embedding tables transposed so the gathers emit
    # (E, B) directly and the small per-field transposes disappear entirely.
    return jnp.concatenate(parts, axis=0).astype(act_dtype)


@functools.partial(jax.jit, static_argnames=("sp_dim", "embed_dim", "ds_dim",
                                             "block_b", "use_bf16_matmul"))
def deepfm_forward(params, ds_input, sp_input, *, sp_dim, embed_dim, ds_dim,
                   block_b=4096, use_bf16_matmul=False):
    # Embedding lookups (data-dependent gather) stay in plain-JAX glue.
    x_ext = build_activation(params, ds_input, sp_input, sp_dim=sp_dim)
    w1, w2, w3 = params["dnn_w"]
    b1, b2, b3 = params["dnn_b"]
    return deepfm_pallas(x_ext, params["fm_w"], params["fm_b"],
                         w1, b1, w2, b2, w3, b3, params["final_bias"],
                         sp_dim=sp_dim, embed_dim=embed_dim, ds_dim=ds_dim,
                         block_b=block_b, use_bf16_matmul=use_bf16_matmul)


def deepfm_reference(params, ds_input, sp_input, *, sp_dim, embed_dim):
    """Pure-JAX reference matching the PyTorch forward semantics."""
    B = ds_input.shape[0]
    lin1 = jnp.stack([params["emb1"][i][sp_input[:, i], 0]
                      for i in range(sp_dim)], axis=-1)
    emb2 = jnp.stack([params["emb2"][i][sp_input[:, i]]
                      for i in range(sp_dim)], axis=1)
    # cal_fm
    s = jnp.sum(emb2, axis=1)                                       # (B, E)
    cross_out = 0.5 * jnp.sum(s * s - jnp.sum(emb2 * emb2, axis=1),
                              axis=-1, keepdims=True)               # (B, 1)
    linear_out = jnp.sum(lin1, axis=-1, keepdims=True)              # (B, 1)
    dense_out = ds_input @ params["fm_w"] + params["fm_b"]          # (B, 1)
    fm_out = cross_out + linear_out + dense_out
    # DNN
    dnn_in = jnp.concatenate([emb2.reshape(B, -1), ds_input], axis=-1)
    w1, w2, w3 = params["dnn_w"]
    b1, b2, b3 = params["dnn_b"]
    h = jnp.maximum(dnn_in @ w1 + b1, 0.0)
    h = jnp.maximum(h @ w2 + b2, 0.0)
    dnn_out = h @ w3 + b3
    return jax.nn.sigmoid(dnn_out + fm_out + params["final_bias"])


# ---------------------------------- main -------------------------------------
if __name__ == "__main__":
    # Small, module-consistent configuration.
    B = 8
    ds_dim = 16
    sp_dim = 4
    embed_dim = 8
    hid_channels = [32, 16]
    num_cats = [10, 20, 30, 40]

    key = jax.random.PRNGKey(0)
    k_param, k_ds, k_sp = jax.random.split(key, 3)

    params = init_params(k_param, num_cats, ds_dim, sp_dim, embed_dim, hid_channels)
    ds_input = jax.random.normal(k_ds, (B, ds_dim), jnp.float32)
    sp_input = jnp.stack(
        [jax.random.randint(jax.random.fold_in(k_sp, i), (B,), 0, num_cats[i])
         for i in range(sp_dim)], axis=-1).astype(jnp.int32)        # (B, sp_dim)

    out = deepfm_forward(params, ds_input, sp_input,
                         sp_dim=sp_dim, embed_dim=embed_dim, ds_dim=ds_dim)
    out = jax.block_until_ready(out)

    ref = deepfm_reference(params, ds_input, sp_input,
                           sp_dim=sp_dim, embed_dim=embed_dim)
    assert out.shape == (B, 1)
    assert jnp.allclose(out, ref, atol=1e-5, rtol=1e-5), (out, ref)

    # TODO(synk): benchmark at production batch sizes (>=8K rows) with xprof;
    # at B=8 the run is pure fixed overhead. For v6e/v7x, flip
    # use_bf16_matmul=True (re-tune the allclose tolerance first); for v5e,
    # also stream the activation as bf16 via build_activation(act_dtype=bf16).
    print("KERNEL_OK")
</pallas_src>

<mosaic_0001>
module attributes {stable_mosaic.version = 11 : i64} {
  func.func @_deepfm_kernel(%arg0: i32, %arg1: memref<52x128xf32, #tpu.memory_space<vmem>>, %arg2: memref<33x52xf32, #tpu.memory_space<vmem>>, %arg3: memref<32x1xf32, #tpu.memory_space<vmem>>, %arg4: memref<16x32xf32, #tpu.memory_space<vmem>>, %arg5: memref<16x1xf32, #tpu.memory_space<vmem>>, %arg6: memref<16x1xf32, #tpu.memory_space<vmem>>, %arg7: memref<1x1xf32, #tpu.memory_space<smem>>, %arg8: memref<1x128xf32, #tpu.memory_space<vmem>>) attributes {dimension_semantics = [#tpu.dimension_semantics<parallel>], iteration_bounds = array<i64: 1>, scalar_prefetch = 0 : i64, scratch_operands = 0 : i64, tpu.core_type = #tpu.core_type<tc>, window_params = [{transform_indices = @transform_0, window_bounds = array<i64: 52, 128>}, {pipeline_mode = #tpu.pipeline_mode<synchronous>, transform_indices = @transform_1, window_bounds = array<i64: 33, 52>}, {pipeline_mode = #tpu.pipeline_mode<synchronous>, transform_indices = @transform_2, window_bounds = array<i64: 32, 1>}, {pipeline_mode = #tpu.pipeline_mode<synchronous>, transform_indices = @transform_3, window_bounds = array<i64: 16, 32>}, {pipeline_mode = #tpu.pipeline_mode<synchronous>, transform_indices = @transform_4, window_bounds = array<i64: 16, 1>}, {pipeline_mode = #tpu.pipeline_mode<synchronous>, transform_indices = @transform_5, window_bounds = array<i64: 16, 1>}, {transform_indices = @transform_6, window_bounds = array<i64: 1, 1>}, {transform_indices = @transform_7, window_bounds = array<i64: 1, 128>}]} {
    %c0 = arith.constant 0 : index
    %c0_0 = arith.constant 0 : index
    %0 = vector.load %arg1[%c0, %c0_0] : memref<52x128xf32, #tpu.memory_space<vmem>>, vector<52x128xf32>
    %1 = vector.extract_strided_slice %0 {offsets = [0, 0], sizes = [32, 128], strides = [1, 1]} : vector<52x128xf32> to vector<32x128xf32>
    %2 = vector.shape_cast %1 : vector<32x128xf32> to vector<4x8x128xf32>
    %cst = arith.constant dense<0.000000e+00> : vector<8x128xf32>
    %3 = vector.multi_reduction <add>, %2, %cst [0] : vector<4x8x128xf32> to vector<8x128xf32>
    %4 = arith.mulf %2, %2 : vector<4x8x128xf32>
    %cst_1 = arith.constant dense<0.000000e+00> : vector<8x128xf32>
    %5 = vector.multi_reduction <add>, %4, %cst_1 [0] : vector<4x8x128xf32> to vector<8x128xf32>
    %6 = arith.mulf %3, %3 : vector<8x128xf32>
    %7 = arith.subf %6, %5 : vector<8x128xf32>
    %cst_2 = arith.constant dense<0.000000e+00> : vector<128xf32>
    %8 = vector.multi_reduction <add>, %7, %cst_2 [0] : vector<8x128xf32> to vector<128xf32>
    %9 = vector.shape_cast %8 : vector<128xf32> to vector<1x128xf32>
    %cst_3 = arith.constant 5.000000e-01 : f32
    %10 = vector.broadcast %cst_3 : f32 to vector<1x128xf32>
    %11 = arith.mulf %10, %9 : vector<1x128xf32>
    %c0_4 = arith.constant 0 : index
    %c0_5 = arith.constant 0 : index
    %12 = vector.load %arg2[%c0_4, %c0_5] : memref<33x52xf32, #tpu.memory_space<vmem>>, vector<33x52xf32>
    %cst_6 = arith.constant dense<0.000000e+00> : vector<33x128xf32>
    %13 = tpu.matmul %12, %0, %cst_6 {dimension_numbers = #tpu.dot_dimension_numbers<[1], [0], [0], [1], [0, 0, 1, 1], [], []>} : vector<33x52xf32>, vector<52x128xf32>, vector<33x128xf32> -> vector<33x128xf32>
    %14 = vector.extract_strided_slice %13 {offsets = [32, 0], sizes = [1, 128], strides = [1, 1]} : vector<33x128xf32> to vector<1x128xf32>
    %15 = vector.extract_strided_slice %13 {offsets = [0, 0], sizes = [32, 128], strides = [1, 1]} : vector<33x128xf32> to vector<32x128xf32>
    %c0_7 = arith.constant 0 : index
    %c0_8 = arith.constant 0 : index
    %16 = vector.load %arg3[%c0_7, %c0_8] : memref<32x1xf32, #tpu.memory_space<vmem>>, vector<32x1xf32>
    %17 = vector.broadcast %16 : vector<32x1xf32> to vector<32x128xf32>
    %18 = arith.addf %15, %17 : vector<32x128xf32>
    %cst_9 = arith.constant 0.000000e+00 : f32
    %19 = vector.broadcast %cst_9 : f32 to vector<32x128xf32>
    %20 = arith.maximumf %18, %19 : vector<32x128xf32>
    %c0_10 = arith.constant 0 : index
    %c0_11 = arith.constant 0 : index
    %21 = vector.load %arg4[%c0_10, %c0_11] : memref<16x32xf32, #tpu.memory_space<vmem>>, vector<16x32xf32>
    %cst_12 = arith.constant dense<0.000000e+00> : vector<16x128xf32>
    %22 = tpu.matmul %21, %20, %cst_12 {dimension_numbers = #tpu.dot_dimension_numbers<[1], [0], [0], [1], [0, 0, 1, 1], [], []>} : vector<16x32xf32>, vector<32x128xf32>, vector<16x128xf32> -> vector<16x128xf32>
    %c0_13 = arith.constant 0 : index
    %c0_14 = arith.constant 0 : index
    %23 = vector.load %arg5[%c0_13, %c0_14] : memref<16x1xf32, #tpu.memory_space<vmem>>, vector<16x1xf32>
    %24 = vector.broadcast %23 : vector<16x1xf32> to vector<16x128xf32>
    %25 = arith.addf %22, %24 : vector<16x128xf32>
    %cst_15 = arith.constant 0.000000e+00 : f32
    %26 = vector.broadcast %cst_15 : f32 to vector<16x128xf32>
    %27 = arith.maximumf %25, %26 : vector<16x128xf32>
    %c0_16 = arith.constant 0 : index
    %c0_17 = arith.constant 0 : index
    %28 = vector.load %arg6[%c0_16, %c0_17] : memref<16x1xf32, #tpu.memory_space<vmem>>, vector<16x1xf32>
    %29 = vector.broadcast %28 : vector<16x1xf32> to vector<16x128xf32>
    %30 = arith.mulf %29, %27 : vector<16x128xf32>
    %cst_18 = arith.constant dense<0.000000e+00> : vector<128xf32>
    %31 = vector.multi_reduction <add>, %30, %cst_18 [0] : vector<16x128xf32> to vector<128xf32>
    %32 = vector.shape_cast %31 : vector<128xf32> to vector<1x128xf32>
    %33 = arith.addf %32, %11 : vector<1x128xf32>
    %34 = arith.addf %33, %14 : vector<1x128xf32>
    %c0_19 = arith.constant 0 : index
    %c0_20 = arith.constant 0 : index
    %35 = memref.load %arg7[%c0_19, %c0_20] : memref<1x1xf32, #tpu.memory_space<smem>>
    %36 = vector.broadcast %35 : f32 to vector<1x128xf32>
    %37 = arith.addf %34, %36 : vector<1x128xf32>
    %38 = arith.negf %37 : vector<1x128xf32>
    %39 = math.exp %38 : vector<1x128xf32>
    %cst_21 = arith.constant 1.000000e+00 : f32
    %40 = vector.broadcast %cst_21 : f32 to vector<1x128xf32>
    %41 = arith.addf %40, %39 : vector<1x128xf32>
    %42 = arith.divf %40, %41 : vector<1x128xf32>
    %c0_22 = arith.constant 0 : index
    %c0_23 = arith.constant 0 : index
    %43 = vector.load %arg8[%c0_22, %c0_23] : memref<1x128xf32, #tpu.memory_space<vmem>>, vector<1x128xf32>
    tpu.vector_store %arg8[%c0_22, %c0_23], %42 {strides = array<i32>} : memref<1x128xf32, #tpu.memory_space<vmem>>, vector<1x128xf32>,
    return
  }
  func.func @transform_0(%arg0: i32) -> (i32, i32) {
    %c0_i32 = arith.constant 0 : i32
    %c0_i32_0 = arith.constant 0 : i32
    return %c0_i32, %arg0 : i32, i32
  }
  func.func @transform_1(%arg0: i32) -> (i32, i32) {
    %c0_i32 = arith.constant 0 : i32
    %c0_i32_0 = arith.constant 0 : i32
    %c0_i32_1 = arith.constant 0 : i32
    return %c0_i32, %c0_i32_0 : i32, i32
  }
  func.func @transform_2(%arg0: i32) -> (i32, i32) {
    %c0_i32 = arith.constant 0 : i32
    %c0_i32_0 = arith.constant 0 : i32
    %c0_i32_1 = arith.constant 0 : i32
    return %c0_i32, %c0_i32_0 : i32, i32
  }
  func.func @transform_3(%arg0: i32) -> (i32, i32) {
    %c0_i32 = arith.constant 0 : i32
    %c0_i32_0 = arith.constant 0 : i32
    %c0_i32_1 = arith.constant 0 : i32
    return %c0_i32, %c0_i32_0 : i32, i32
  }
  func.func @transform_4(%arg0: i32) -> (i32, i32) {
    %c0_i32 = arith.constant 0 : i32
    %c0_i32_0 = arith.constant 0 : i32
    %c0_i32_1 = arith.constant 0 : i32
    return %c0_i32, %c0_i32_0 : i32, i32
  }
  func.func @transform_5(%arg0: i32) -> (i32, i32) {
    %c0_i32 = arith.constant 0 : i32
    %c0_i32_0 = arith.constant 0 : i32
    %c0_i32_1 = arith.constant 0 : i32
    return %c0_i32, %c0_i32_0 : i32, i32
  }
  func.func @transform_6(%arg0: i32) -> (i32, i32) {
    %c0_i32 = arith.constant 0 : i32
    %c0_i32_0 = arith.constant 0 : i32
    %c0_i32_1 = arith.constant 0 : i32
    return %c0_i32, %c0_i32_0 : i32, i32
  }
  func.func @transform_7(%arg0: i32) -> (i32, i32) {
    %c0_i32 = arith.constant 0 : i32
    %c0_i32_0 = arith.constant 0 : i32
    return %c0_i32, %arg0 : i32, i32
  }
}

</mosaic_0001>

<bundles_post_ra>
// kernel: deepfm_forward.1
= control target key start
LH: loop header
LB: loop body
LE: loop exit
PB: predicated region body
PF: predicated region fallthrough
CT: control target
= control target key end

     0   :  { %v437_v0 = vmov 0.0|0.0   ;;  %vm438_vm0 = vmmov 0   ;;  %v439_v9 = vmov 0.0   ;;  %v440_v21 = vmov 0   ;;  %s576_s0 = inlined_call_operand.vmem [shape: f32[52,128], index: 0, kind: input, shape index: {}]   ;;  %s577_s2 = inlined_call_operand.vmem [shape: f32[32,1], index: 2, kind: input, shape index: {}]   ;;  %s578_s4 = inlined_call_operand.vmem [shape: f32[16,1], index: 4, kind: input, shape index: {}]   ;;  %s579_s1 = inlined_call_operand.vmem [shape: f32[33,52], index: 1, kind: input, shape index: {}]   ;;  %s580_s5 = inlined_call_operand.vmem [shape: f32[16,1], index: 5, kind: input, shape index: {}]   ;;  %s581_s3 = inlined_call_operand.vmem [shape: f32[16,32], index: 3, kind: input, shape index: {}]   ;;  %s582_s6 = inlined_call_operand.<no memory space> [shape: f32[1,1], index: 6, kind: input, shape index: {}]   ;;  %s583_s7 = inlined_call_operand.vmem [shape: f32[1,128], index: 7, kind: output, shape index: {}]  }
   0x1   :  { %402 = vmatprep.subr.bf16.mxu0 %v437_v0  ;;  %v27_v1 = vld [vmem:[%s576_s0] sm:$0xff]  ;;  %v28_v2 = vld [vmem:[%s576_s0 + $0x8] sm:$0xff]  ;;  %419 = vmatprep.subr.bf16.mxu1 %v437_v0  ;;  %v29_v3 = vld [vmem:[%s576_s0 + $0x10] sm:$0xff]  ;;  %vm74_vm1 = vcmask 1043456   ;;  %vm58_vm2 = vcmask 424960   ;;  %vm214_vm3 = vcmask 261120  }
   0x2   :  { %v34_v4 = vadd.f32 %v28_v2, %v27_v1  ;;  %v37_v5 = vmul.f32 %v27_v1, %v27_v1  ;;  %v38_v6 = vmul.f32 %v28_v2, %v28_v2  ;;  %v403_v7 = vpack.c.bf16 %v28_v2, %v27_v1  ;;  %v30_v8 = vld [vmem:[%s576_s0 + $0x18] sm:$0xff]  ;;  %376 = vmatprep.mubr.msk.f32.mxu0 %vm438_vm0, %v439_v9  ;;  %v168_v15 = vld [vmem:[%s577_s2] sm:$0xff]  ;;  %v32_v17 = vld [vmem:[%s576_s0 + $0x28] sm:$0xff] }
   0x3   :  { %v39_v10 = vmul.f32 %v29_v3, %v29_v3  ;;  %v40_v11 = vmul.f32 %v30_v8, %v30_v8  ;;  %385 = vmatprep.mubr.msk.f32.mxu1 %vm438_vm0, %v439_v9  ;;  %v406_v14 = vpack.c.bf16 %v30_v8, %v29_v3  ;;  %v31_v16 = vld [vmem:[%s576_s0 + $0x20] sm:$0xff]  ;;  %v170_v18 = vld [vmem:[%s577_s2 + $0x10] sm:$0xff]  ;;  %431 = vset.pattern.permute.xlu0 %v440_v21  ;;  %v169_v25 = vld [vmem:[%s577_s2 + $0x8] sm:$0xff] }
   0x4   :  { %v41_v12 = vadd.f32 %v38_v6, %v37_v5  ;;  %404 = vmatpush3.bf16.msra.mxu0 %v403_v7  ;;  %423 = vmatpush3.bf16.msra.mxu1 %v403_v7  ;;  %v35_v13 = vadd.f32 %v34_v4, %v29_v3  ;;  %v409_v24 = vpack.c.bf16 %v32_v17, %v31_v16  ;;  %v171_v26 = vld [vmem:[%s577_s2 + $0x18] sm:$0xff]  ;;  %v202_v28 = vld [vmem:[%s578_s4] sm:$0xff]  ;;  %v203_v29 = vld [vmem:[%s578_s4 + $0x8] sm:$0xff] }
   0x5   :  { %405 = vmatprep.subr.bf16.mxu0 %v437_v0  ;;  %420 = vmatprep.subr.bf16.mxu1 %v437_v0  ;;  %v33_v30 = vld [vmem:[%s576_s0 + $0x30] sm:$0xf]  ;;  %v53_v31 = vld [vmem:[%s579_s1] sm:$0xff]  ;;  %v56_v32 = vld [vmem:[%s579_s1 + $0x18] sm:$0xff] }
   0x6   :  { %v36_v19 = vadd.f32 %v35_v13, %v30_v8  ;;  %v42_v20 = vadd.f32 %v41_v12, %v39_v10  ;;  %432 = vset.pattern.permute.xlu1 %v440_v21  ;;  %174 = vperm.xlu0 %431, %v168_v15   ;;  %v298_v33 = vld [vmem:[%s580_s5] sm:$0xff]  ;;  %v299_v34 = vld [vmem:[%s580_s5 + $0x8] sm:$0xff]  ;;  %v55_v36 = vld [vmem:[%s579_s1 + $0x10] sm:$0xff] }
   0x7   :  { %184 = vperm.xlu1 %432, %v170_v18   ;;  %v54_v35 = vld [vmem:[%s579_s1 + $0x8] sm:$0xff]  ;;  %v57_v37 = vld [vmem:[%s579_s1 + $0x20] sm:$0x1] }
   0x8   :  { %v43_v22 = vadd.f32 %v42_v20, %v40_v11  ;;  %v44_v23 = vmul.f32 %v36_v19, %v36_v19  ;;  %407 = vmatpush3.bf16.msra.mxu0 %v406_v14  ;;  %424 = vmatpush3.bf16.msra.mxu1 %v406_v14  ;;  %v200_v38 = vld [vmem:[%s581_s3] sm:$0xff]  ;;  %v201_v61 = vld [vmem:[%s581_s3 + $0x8] sm:$0xff] }
   0x9   :  { %408 = vmatprep.subr.bf16.mxu0 %v437_v0  ;;  %421 = vmatprep.subr.bf16.mxu1 %v437_v0 }
   0xa   :  { %v515_v27 = vsub.f32 %v44_v23, %v43_v22  ;;  %179 = vperm.xlu0 %431, %v169_v25  }
   0xb   :  { %189 = vperm.xlu1 %432, %v171_v26  }
   0xc   :  { %410 = vmatpush3.bf16.msra.mxu0 %v409_v24  ;;  %425 = vmatpush3.bf16.msra.mxu1 %v409_v24  ;;  %v46_v0 = vrot.slane %v515_v27, 4 }
   0xd   :  { %374 = vmatprep.subr.mxu0 %v439_v9  ;;  %422 = vmatprep.subr.mxu1 %v439_v9 }
   0xe   :  { %206 = vperm.xlu0 %431, %v202_v28   ;;  %v47_v1 = vadd.f32 %v46_v0, %v515_v27  ;;  %v322_v27 = vstv %s582_s6 }
   0xf   :  { %211 = vperm.xlu1 %432, %v203_v29  }
  0x10   :  { %375 = vmatpush3.msk.msra.mxu0 %vm74_vm1, %v33_v30  ;;  %426 = vmatpush3.msk.msra.mxu1 %vm74_vm1, %v33_v30  ;;  %v48_v7 = vrot.slane %v47_v1, 2 }
  0x11   :  { %377 = vmatmul.mubr.msk.f32.vlgmr.msra.gmra.mrb[0].mxu0 %vm58_vm2, %v53_v31  ;;  %386 = vmatmul.mubr.msk.f32.vlgmr.msra.gmra.mrb[0].mxu1 %vm58_vm2, %v56_v32 }
  0x12   :  { %379 = vmatprep.mubr.msk.f32.mxu0 %vm438_vm0, %v439_v9  ;;  %388 = vmatprep.mubr.msk.f32.mxu1 %vm438_vm0, %v439_v9  ;;  %v49_v14 = vadd.f32 %v48_v7, %v47_v1 }
  0x13   :  { %302 = vperm.xlu0 %431, %v298_v33   ;;  %307 = vperm.xlu1 %432, %v299_v34  }
  0x14   :  { %v50_v17 = vrot.slane %v49_v14, 1 }
  0x15   :  { %380 = vmatmul.mubr.msk.f32.gmra.mrb[2].mxu0 %vm58_vm2, %v54_v35  ;;  %389 = vmatmul.mubr.msk.f32.gmra.mrb[2].mxu1 %vm58_vm2, %v57_v37 }
  0x16   :  { %382 = vmatprep.mubr.msk.f32.mxu0 %vm438_vm0, %v439_v9  ;;  %399 = vmatprep.mubr.msk.f32.mxu1 %vm214_vm3, %v200_v38  ;;  %v51_v20 = vadd.f32 %v50_v17, %v49_v14 }
  0x18   :  { %v52_v23 = vmul.f32 0.5, %v51_v20 }
  0x19   :  { %383 = vmatmul.mubr.msk.f32.gmra.mrb[4].mxu0 %vm58_vm2, %v55_v36 }
  0x85   :  { %v175_v39 = vpop.permute.xlu0 %174 }
  0x86   :  { %v185_v40 = vpop.permute.xlu1 %184 }
  0x89   :  { %v180_v46 = vpop.permute.xlu0 %179 }
  0x8a   :  { %v190_v50 = vpop.permute.xlu1 %189 }
  0x8d   :  { %v207_v3 = vpop.permute.xlu0 %206 }
  0x8e   :  { %v212_v2 = vpop.permute.xlu1 %211 }
  0x92   :  { %v308_v10 = vpop.permute.xlu1 %307  ;;  %v303_v12 = vpop.permute.xlu0 %302 }
  0xe4   :  { %v144_v41 = vpop.f32.mrb[0].mxu0  ;;  %v159_v42 = vpop.f32.mrb[0].mxu1 }
  0xe5   :  { %v378_v43 = vpop.f32.mrb[1].mxu0  ;;  %v387_v44 = vpop.f32.mrb[1].mxu1  ;;  %v192_v45 = vadd.f32 %v175_v39, %v144_v41  ;;  %v195_v53 = vadd.f32 %v190_v50, %v159_v42 }
  0xe7   :  { %v196_v51 = vmax.f32 %v192_v45, 0.0  ;;  %v199_v58 = vmax.f32 %v195_v53, 0.0 }
  0xe8   :  { %v149_v47 = vpop.f32.mrb[2].mxu0  ;;  %v164_v62 = vpop.f32.mrb[2].mxu1 }
  0xe9   :  { %v193_v48 = vadd.f32 %v180_v46, %v149_v47  ;;  %v381_v49 = vpop.f32.mrb[3].mxu0  ;;  %v390_v63 = vpop.f32.mrb[3].mxu1 }
  0xeb   :  { %v197_v52 = vmax.f32 %v193_v48, 0.0 }
  0xec   :  { %v154_v54 = vpop.f32.mrb[4].mxu0 }
  0xed   :  { %v411_v55 = vpack.c.bf16 %v197_v52, %v196_v51  ;;  %v194_v56 = vadd.f32 %v185_v40, %v154_v54  ;;  %v384_v57 = vpop.f32.mrb[5].mxu0 }
  0xef   :  { %v198_v59 = vmax.f32 %v194_v56, 0.0  ;;  %412 = vmatprep.subr.bf16.mxu1 %v411_v55 }
  0xf0   :  { %414 = vmatpush3.bf16.msra.mxu1 %v411_v55 }
  0xf1   :  { %v415_v60 = vpack.c.bf16 %v199_v58, %v198_v59 }
  0xf3   :  { %416 = vmatprep.subr.bf16.mxu1 %v415_v60 }
  0xf4   :  { %418 = vmatpush3.bf16.msra.mxu1 %v415_v60 }
  0xf7   :  { %400 = vmatmul.mubr.msk.f32.vlgmr.msra.gmra.mrb[4].mxu1 %vm214_vm3, %v201_v61 }
 0x1ca   :  { %v401_v4 = vpop.f32.mrb[4].mxu1 }
 0x1cb   :  { %v293_v5 = vadd.f32 %v401_v4, %v212_v2  ;;  %v287_v6 = vpop.f32.mrb[5].mxu1 }
 0x1cc   :  { %v288_v8 = vadd.f32 %v287_v6, %v207_v3 }
 0x1cd   :  { %v297_v9 = vmax.f32 %v293_v5, 0.0 }
 0x1ce   :  { %v296_v11 = vmax.f32 %v288_v8, 0.0 }
 0x1cf   :  { %v311_v13 = vmul.f32 %v308_v10, %v297_v9 }
 0x1d0   :  { %v310_v15 = vmul.f32 %v303_v12, %v296_v11 }
 0x1d2   :  { %v312_v16 = vadd.f32 %v311_v13, %v310_v15 }
 0x1d4   :  { %v313_v18 = vrot.slane %v312_v16, 4 }
 0x1d6   :  { %v314_v19 = vadd.f32 %v313_v18, %v312_v16 }
 0x1d8   :  { %v315_v21 = vrot.slane %v314_v19, 2 }
 0x1da   :  { %v316_v22 = vadd.f32 %v315_v21, %v314_v19 }
 0x1dc   :  { %v317_v24 = vrot.slane %v316_v22, 1 }
 0x1de   :  { %v318_v25 = vadd.f32 %v317_v24, %v316_v22 }
 0x1e0   :  { %v319_v26 = vadd.f32 %v318_v25, %v52_v23 }
 0x1e2   :  { %v320_v28 = vadd.f32 %v319_v26, %v164_v62 }
 0x1e4   :  { %v323_v29 = vadd.f32 %v322_v27, %v320_v28 }
 0x1e6   :  { %v343_v30 = vmul.f32 -1.442695, %v323_v29 }
 0x1e8   :  { %433 = vpow2.f32 %v343_v30 }
 0x1f2   :  { %v434_v31 = vpop.eup %433 }
 0x1f3   :  { %v327_v32 = vadd.f32 1.0, %v434_v31 }
 0x1f5   :  { %435 = vrcp.f32 %v327_v32 }
 0x1ff   :  { %v436_v33 = vpop.eup %435 }
 0x200   :  { %330 = vst [vmem:[%s583_s7] sm:$0x1] %v436_v33 }

</bundles_post_ra>
